<compile_context>
chip_gen: v7x
topology: tpu7x:2x2x1
jax: 0.10.0
libtpu: 0.0.40
codegen_flags: <defaults>
</compile_context>

<pallas_src>
import functools

import jax
import jax.numpy as jnp
from jax.experimental import pallas as pl
from jax.experimental.pallas import tpu as pltpu


def _encoder_seq_kernel(x_ref, m_ref, h0_ref, c0_ref, wx_ref, wh_ref, b_ref,
                        h_out_ref, c_out_ref, h_scr, c_scr,
                        *, forget_bias, compute_dtype):
    """One grid step == one timestep of the masked LSTM cell.

    h/c state lives in VMEM scratch across timesteps; per-gate weights have a
    constant index_map so they are fetched once and stay resident.
    """
    t = pl.program_id(0)

    @pl.when(t == 0)
    def _():
        h_scr[...] = h0_ref[...]
        c_scr[...] = c0_ref[...]

    x = x_ref[...].astype(compute_dtype)       # [B, input_size]
    h_prev = h_scr[...]                        # [B, H]  (f32 carried state)
    c_prev = c_scr[...]                        # [B, H]
    h_mm = h_prev.astype(compute_dtype)

    # Per-gate matmuls: lane-dense [B, H] outputs (no concat, no lane-offset
    # slicing of a [B, 4H] gate buffer).
    def gate(g):
        acc = jnp.dot(x, wx_ref[g].astype(compute_dtype),
                      preferred_element_type=jnp.float32)
        acc = acc + jnp.dot(h_mm, wh_ref[g].astype(compute_dtype),
                            preferred_element_type=jnp.float32)
        return acc + b_ref[g]                  # b_ref[g]: [1, H] broadcasts

    i_g = gate(0)
    j_g = gate(1)
    f_g = gate(2)
    o_g = gate(3)

    new_c = c_prev * jax.nn.sigmoid(f_g + forget_bias) + \
        jax.nn.sigmoid(i_g) * jnp.tanh(j_g)
    new_h = jnp.tanh(new_c) * jax.nn.sigmoid(o_g)

    # Mask blend: old + m*(new - old)  ==  m*new + (1-m)*old.
    m = m_ref[...]                             # [B, 1]
    mc = c_prev + m * (new_c - c_prev)
    mh = h_prev + m * (new_h - h_prev)

    c_scr[...] = mc
    h_scr[...] = mh
    c_out_ref[...] = mc.astype(c_out_ref.dtype)
    h_out_ref[...] = mh.astype(h_out_ref.dtype)


def _split_weights(weight, bias, input_size, hidden_size):
    """weight: [input+H, 4H] (torch Linear weight.T), bias: [4H].

    Returns per-gate stacks wx4 [4, input, H], wh4 [4, H, H], b4 [4, 1, H]
    (gate order i, j, f, o — same as torch.chunk along dim=1)."""
    weight = weight.astype(jnp.float32)
    wx = weight[:input_size]                   # rows for cur_embed
    wh = weight[input_size:]                   # rows for last_hidden
    wx4 = wx.reshape(input_size, 4, hidden_size).transpose(1, 0, 2)
    wh4 = wh.reshape(hidden_size, 4, hidden_size).transpose(1, 0, 2)
    b4 = bias.astype(jnp.float32).reshape(4, 1, hidden_size)
    return wx4, wh4, b4


def encoder_sequence_forward(embeds, masks, h0, c0, weight, bias, *,
                             forget_bias=1.0, compute_dtype=jnp.float32):
    """Fused sequence of masked LSTM-cell steps in a single pallas_call.

    embeds: [T, B, input_size], masks: [T, B], h0/c0: [B, H],
    weight: [input_size + H, 4H], bias: [4H].
    Returns (mask_hiddens, mask_cells), each [T, B, H] — identical to applying
    EncoderCell.forward step by step.
    """
    T, B, input_size = embeds.shape
    H = h0.shape[1]

    wx4, wh4, b4 = _split_weights(weight, bias, input_size, H)
    masks3 = masks.reshape(T, B, 1).astype(jnp.float32)

    kernel = functools.partial(_encoder_seq_kernel,
                               forget_bias=float(forget_bias),
                               compute_dtype=compute_dtype)

    hs, cs = pl.pallas_call(
        kernel,
        out_shape=(
            jax.ShapeDtypeStruct((T, B, H), jnp.float32),
            jax.ShapeDtypeStruct((T, B, H), jnp.float32),
        ),
        grid=(T,),
        in_specs=[
            pl.BlockSpec((None, B, input_size), lambda t: (t, 0, 0)),  # x_t
            pl.BlockSpec((None, B, 1), lambda t: (t, 0, 0)),           # m_t
            pl.BlockSpec((B, H), lambda t: (0, 0)),                    # h0
            pl.BlockSpec((B, H), lambda t: (0, 0)),                    # c0
            pl.BlockSpec((4, input_size, H), lambda t: (0, 0, 0)),     # wx (resident)
            pl.BlockSpec((4, H, H), lambda t: (0, 0, 0)),              # wh (resident)
            pl.BlockSpec((4, 1, H), lambda t: (0, 0, 0)),              # bias (resident)
        ],
        out_specs=(
            pl.BlockSpec((None, B, H), lambda t: (t, 0, 0)),
            pl.BlockSpec((None, B, H), lambda t: (t, 0, 0)),
        ),
        scratch_shapes=[
            pltpu.VMEM((B, H), jnp.float32),   # carried hidden state
            pltpu.VMEM((B, H), jnp.float32),   # carried cell state
        ],
        compiler_params=pltpu.CompilerParams(
            dimension_semantics=("arbitrary",)),
    )(embeds, masks3, h0, c0, wx4, wh4, b4)
    return hs, cs


def encoder_cell_forward(cur_embed, last_hidden, last_cell, mask, weight, bias,
                         *, forget_bias=1.0, compute_dtype=jnp.float32):
    """Single EncoderCell step — matches the PyTorch module's forward.

    Returns (mask_hidden, mask_cell), both [B, H]."""
    hs, cs = encoder_sequence_forward(
        cur_embed[None], mask.reshape(1, -1), last_hidden, last_cell,
        weight, bias, forget_bias=forget_bias, compute_dtype=compute_dtype)
    return hs[0], cs[0]


def reference_forward(cur_embed, last_hidden, last_cell, mask, weight, bias,
                      forget_bias=1.0):
    """Pure-JAX reference mirroring the PyTorch module."""
    inputs = jnp.concatenate([cur_embed, last_hidden], axis=1)
    gates = inputs @ weight + bias
    H = last_hidden.shape[1]
    i, j, f, o = (gates[:, k * H:(k + 1) * H] for k in range(4))
    new_cell = last_cell * jax.nn.sigmoid(f + forget_bias) + \
        jax.nn.sigmoid(i) * jnp.tanh(j)
    new_hidden = jnp.tanh(new_cell) * jax.nn.sigmoid(o)
    m = mask[:, None]
    return (m * new_hidden + (1 - m) * last_hidden,
            m * new_cell + (1 - m) * last_cell)


if __name__ == "__main__":
    B = 8
    hidden_size = 32
    input_size = 32
    T = 6
    forget_bias = 1.0

    key = jax.random.PRNGKey(0)
    kx, kh, kc, km, kw, kb, ks, kms = jax.random.split(key, 8)

    cur_embed = jax.random.normal(kx, (B, input_size), dtype=jnp.float32)
    last_hidden = jax.random.normal(kh, (B, hidden_size), dtype=jnp.float32)
    last_cell = jax.random.normal(kc, (B, hidden_size), dtype=jnp.float32)
    mask = (jax.random.uniform(km, (B,)) > 0.5).astype(jnp.float32)

    in_feats = input_size + hidden_size
    out_feats = 4 * hidden_size
    bound = 1.0 / jnp.sqrt(in_feats)
    weight = jax.random.uniform(kw, (in_feats, out_feats),
                                minval=-bound, maxval=bound, dtype=jnp.float32)
    bias = jax.random.uniform(kb, (out_feats,),
                              minval=-bound, maxval=bound, dtype=jnp.float32)

    # --- single cell step (exactly the module's forward) --------------------
    new_hidden, new_cell = encoder_cell_forward(
        cur_embed, last_hidden, last_cell, mask, weight, bias,
        forget_bias=forget_bias)
    jax.block_until_ready((new_hidden, new_cell))

    ref_hidden, ref_cell = reference_forward(
        cur_embed, last_hidden, last_cell, mask, weight, bias, forget_bias)
    assert jnp.allclose(new_hidden, ref_hidden, atol=1e-4, rtol=1e-4)
    assert jnp.allclose(new_cell, ref_cell, atol=1e-4, rtol=1e-4)

    # --- fused sequence: T cell applications in ONE pallas_call -------------
    embeds = jax.random.normal(ks, (T, B, input_size), dtype=jnp.float32)
    masks = (jax.random.uniform(kms, (T, B)) > 0.3).astype(jnp.float32)

    hs, cs = encoder_sequence_forward(
        embeds, masks, last_hidden, last_cell, weight, bias,
        forget_bias=forget_bias)
    jax.block_until_ready((hs, cs))

    h_ref, c_ref = last_hidden, last_cell
    for t in range(T):
        h_ref, c_ref = reference_forward(
            embeds[t], h_ref, c_ref, masks[t], weight, bias, forget_bias)
        assert jnp.allclose(hs[t], h_ref, atol=1e-4, rtol=1e-4), t
        assert jnp.allclose(cs[t], c_ref, atol=1e-4, rtol=1e-4), t

    print("KERNEL_OK")
</pallas_src>

<mosaic_0001>
module attributes {stable_mosaic.version = 11 : i64} {
  func.func @_encoder_seq_kernel(%arg0: i32, %arg1: memref<1x8x32xf32, #tpu.memory_space<vmem>>, %arg2: memref<1x8x1xf32, #tpu.memory_space<vmem>>, %arg3: memref<8x32xf32, #tpu.memory_space<vmem>>, %arg4: memref<8x32xf32, #tpu.memory_space<vmem>>, %arg5: memref<4x32x32xf32, #tpu.memory_space<vmem>>, %arg6: memref<4x32x32xf32, #tpu.memory_space<vmem>>, %arg7: memref<4x1x32xf32, #tpu.memory_space<vmem>>, %arg8: memref<1x8x32xf32, #tpu.memory_space<vmem>>, %arg9: memref<1x8x32xf32, #tpu.memory_space<vmem>>, %arg10: memref<8x32xf32, #tpu.memory_space<vmem>>, %arg11: memref<8x32xf32, #tpu.memory_space<vmem>>) attributes {dimension_semantics = [#tpu.dimension_semantics<arbitrary>], iteration_bounds = array<i64: 1>, scalar_prefetch = 0 : i64, scratch_operands = 2 : i64, tpu.core_type = #tpu.core_type<tc>, window_params = [{transform_indices = @transform_0, window_bounds = array<i64: 1, 8, 32>}, {transform_indices = @transform_1, window_bounds = array<i64: 1, 8, 1>}, {pipeline_mode = #tpu.pipeline_mode<synchronous>, transform_indices = @transform_2, window_bounds = array<i64: 8, 32>}, {pipeline_mode = #tpu.pipeline_mode<synchronous>, transform_indices = @transform_3, window_bounds = array<i64: 8, 32>}, {pipeline_mode = #tpu.pipeline_mode<synchronous>, transform_indices = @transform_4, window_bounds = array<i64: 4, 32, 32>}, {pipeline_mode = #tpu.pipeline_mode<synchronous>, transform_indices = @transform_5, window_bounds = array<i64: 4, 32, 32>}, {pipeline_mode = #tpu.pipeline_mode<synchronous>, transform_indices = @transform_6, window_bounds = array<i64: 4, 1, 32>}, {transform_indices = @transform_7, window_bounds = array<i64: 1, 8, 32>}, {transform_indices = @transform_8, window_bounds = array<i64: 1, 8, 32>}]} {
    %c0_i32 = arith.constant 0 : i32
    %0 = arith.cmpi eq, %arg0, %c0_i32 : i32
    %1 = arith.extui %0 : i1 to i32
    %c0_i32_0 = arith.constant 0 : i32
    %2 = arith.cmpi ne, %1, %c0_i32_0 : i32
    scf.if %2 {
      %c0_64 = arith.constant 0 : index
      %c0_65 = arith.constant 0 : index
      %92 = vector.load %arg3[%c0_64, %c0_65] : memref<8x32xf32, #tpu.memory_space<vmem>>, vector<8x32xf32>
      %c0_66 = arith.constant 0 : index
      %c0_67 = arith.constant 0 : index
      %93 = vector.load %arg10[%c0_66, %c0_67] : memref<8x32xf32, #tpu.memory_space<vmem>>, vector<8x32xf32>
      tpu.vector_store %arg10[%c0_66, %c0_67], %92 {strides = array<i32>} : memref<8x32xf32, #tpu.memory_space<vmem>>, vector<8x32xf32>,
      %c0_68 = arith.constant 0 : index
      %c0_69 = arith.constant 0 : index
      %94 = vector.load %arg4[%c0_68, %c0_69] : memref<8x32xf32, #tpu.memory_space<vmem>>, vector<8x32xf32>
      %c0_70 = arith.constant 0 : index
      %c0_71 = arith.constant 0 : index
      %95 = vector.load %arg11[%c0_70, %c0_71] : memref<8x32xf32, #tpu.memory_space<vmem>>, vector<8x32xf32>
      tpu.vector_store %arg11[%c0_70, %c0_71], %94 {strides = array<i32>} : memref<8x32xf32, #tpu.memory_space<vmem>>, vector<8x32xf32>,
    } else {
    }
    %c0 = arith.constant 0 : index
    %c0_1 = arith.constant 0 : index
    %c0_2 = arith.constant 0 : index
    %3 = vector.load %arg1[%c0, %c0_1, %c0_2] : memref<1x8x32xf32, #tpu.memory_space<vmem>>, vector<1x8x32xf32>
    %4 = vector.shape_cast %3 : vector<1x8x32xf32> to vector<8x32xf32>
    %c0_3 = arith.constant 0 : index
    %c0_4 = arith.constant 0 : index
    %5 = vector.load %arg10[%c0_3, %c0_4] : memref<8x32xf32, #tpu.memory_space<vmem>>, vector<8x32xf32>
    %c0_5 = arith.constant 0 : index
    %c0_6 = arith.constant 0 : index
    %6 = vector.load %arg11[%c0_5, %c0_6] : memref<8x32xf32, #tpu.memory_space<vmem>>, vector<8x32xf32>
    %c0_7 = arith.constant 0 : index
    %c0_8 = arith.constant 0 : index
    %c0_9 = arith.constant 0 : index
    %7 = vector.load %arg5[%c0_7, %c0_8, %c0_9] : memref<4x32x32xf32, #tpu.memory_space<vmem>>, vector<1x32x32xf32>
    %8 = vector.shape_cast %7 : vector<1x32x32xf32> to vector<32x32xf32>
    %cst = arith.constant dense<0.000000e+00> : vector<8x32xf32>
    %9 = tpu.matmul %4, %8, %cst {dimension_numbers = #tpu.dot_dimension_numbers<[1], [0], [0], [1], [0, 0, 1, 1], [], []>} : vector<8x32xf32>, vector<32x32xf32>, vector<8x32xf32> -> vector<8x32xf32>
    %c0_10 = arith.constant 0 : index
    %c0_11 = arith.constant 0 : index
    %c0_12 = arith.constant 0 : index
    %10 = vector.load %arg6[%c0_10, %c0_11, %c0_12] : memref<4x32x32xf32, #tpu.memory_space<vmem>>, vector<1x32x32xf32>
    %11 = vector.shape_cast %10 : vector<1x32x32xf32> to vector<32x32xf32>
    %cst_13 = arith.constant dense<0.000000e+00> : vector<8x32xf32>
    %12 = tpu.matmul %5, %11, %cst_13 {dimension_numbers = #tpu.dot_dimension_numbers<[1], [0], [0], [1], [0, 0, 1, 1], [], []>} : vector<8x32xf32>, vector<32x32xf32>, vector<8x32xf32> -> vector<8x32xf32>
    %13 = arith.addf %9, %12 : vector<8x32xf32>
    %c0_14 = arith.constant 0 : index
    %c0_15 = arith.constant 0 : index
    %c0_16 = arith.constant 0 : index
    %14 = vector.load %arg7[%c0_14, %c0_15, %c0_16] : memref<4x1x32xf32, #tpu.memory_space<vmem>>, vector<1x1x32xf32>
    %15 = vector.shape_cast %14 : vector<1x1x32xf32> to vector<1x32xf32>
    %16 = vector.broadcast %15 : vector<1x32xf32> to vector<8x32xf32>
    %17 = arith.addf %13, %16 : vector<8x32xf32>
    %c1 = arith.constant 1 : index
    %c0_17 = arith.constant 0 : index
    %c0_18 = arith.constant 0 : index
    %18 = vector.load %arg5[%c1, %c0_17, %c0_18] : memref<4x32x32xf32, #tpu.memory_space<vmem>>, vector<1x32x32xf32>
    %19 = vector.shape_cast %18 : vector<1x32x32xf32> to vector<32x32xf32>
    %cst_19 = arith.constant dense<0.000000e+00> : vector<8x32xf32>
    %20 = tpu.matmul %4, %19, %cst_19 {dimension_numbers = #tpu.dot_dimension_numbers<[1], [0], [0], [1], [0, 0, 1, 1], [], []>} : vector<8x32xf32>, vector<32x32xf32>, vector<8x32xf32> -> vector<8x32xf32>
    %c1_20 = arith.constant 1 : index
    %c0_21 = arith.constant 0 : index
    %c0_22 = arith.constant 0 : index
    %21 = vector.load %arg6[%c1_20, %c0_21, %c0_22] : memref<4x32x32xf32, #tpu.memory_space<vmem>>, vector<1x32x32xf32>
    %22 = vector.shape_cast %21 : vector<1x32x32xf32> to vector<32x32xf32>
    %cst_23 = arith.constant dense<0.000000e+00> : vector<8x32xf32>
    %23 = tpu.matmul %5, %22, %cst_23 {dimension_numbers = #tpu.dot_dimension_numbers<[1], [0], [0], [1], [0, 0, 1, 1], [], []>} : vector<8x32xf32>, vector<32x32xf32>, vector<8x32xf32> -> vector<8x32xf32>
    %24 = arith.addf %20, %23 : vector<8x32xf32>
    %c1_24 = arith.constant 1 : index
    %c0_25 = arith.constant 0 : index
    %c0_26 = arith.constant 0 : index
    %25 = vector.load %arg7[%c1_24, %c0_25, %c0_26] : memref<4x1x32xf32, #tpu.memory_space<vmem>>, vector<1x1x32xf32>
    %26 = vector.shape_cast %25 : vector<1x1x32xf32> to vector<1x32xf32>
    %27 = vector.broadcast %26 : vector<1x32xf32> to vector<8x32xf32>
    %28 = arith.addf %24, %27 : vector<8x32xf32>
    %c2 = arith.constant 2 : index
    %c0_27 = arith.constant 0 : index
    %c0_28 = arith.constant 0 : index
    %29 = vector.load %arg5[%c2, %c0_27, %c0_28] : memref<4x32x32xf32, #tpu.memory_space<vmem>>, vector<1x32x32xf32>
    %30 = vector.shape_cast %29 : vector<1x32x32xf32> to vector<32x32xf32>
    %cst_29 = arith.constant dense<0.000000e+00> : vector<8x32xf32>
    %31 = tpu.matmul %4, %30, %cst_29 {dimension_numbers = #tpu.dot_dimension_numbers<[1], [0], [0], [1], [0, 0, 1, 1], [], []>} : vector<8x32xf32>, vector<32x32xf32>, vector<8x32xf32> -> vector<8x32xf32>
    %c2_30 = arith.constant 2 : index
    %c0_31 = arith.constant 0 : index
    %c0_32 = arith.constant 0 : index
    %32 = vector.load %arg6[%c2_30, %c0_31, %c0_32] : memref<4x32x32xf32, #tpu.memory_space<vmem>>, vector<1x32x32xf32>
    %33 = vector.shape_cast %32 : vector<1x32x32xf32> to vector<32x32xf32>
    %cst_33 = arith.constant dense<0.000000e+00> : vector<8x32xf32>
    %34 = tpu.matmul %5, %33, %cst_33 {dimension_numbers = #tpu.dot_dimension_numbers<[1], [0], [0], [1], [0, 0, 1, 1], [], []>} : vector<8x32xf32>, vector<32x32xf32>, vector<8x32xf32> -> vector<8x32xf32>
    %35 = arith.addf %31, %34 : vector<8x32xf32>
    %c2_34 = arith.constant 2 : index
    %c0_35 = arith.constant 0 : index
    %c0_36 = arith.constant 0 : index
    %36 = vector.load %arg7[%c2_34, %c0_35, %c0_36] : memref<4x1x32xf32, #tpu.memory_space<vmem>>, vector<1x1x32xf32>
    %37 = vector.shape_cast %36 : vector<1x1x32xf32> to vector<1x32xf32>
    %38 = vector.broadcast %37 : vector<1x32xf32> to vector<8x32xf32>
    %39 = arith.addf %35, %38 : vector<8x32xf32>
    %c3 = arith.constant 3 : index
    %c0_37 = arith.constant 0 : index
    %c0_38 = arith.constant 0 : index
    %40 = vector.load %arg5[%c3, %c0_37, %c0_38] : memref<4x32x32xf32, #tpu.memory_space<vmem>>, vector<1x32x32xf32>
    %41 = vector.shape_cast %40 : vector<1x32x32xf32> to vector<32x32xf32>
    %cst_39 = arith.constant dense<0.000000e+00> : vector<8x32xf32>
    %42 = tpu.matmul %4, %41, %cst_39 {dimension_numbers = #tpu.dot_dimension_numbers<[1], [0], [0], [1], [0, 0, 1, 1], [], []>} : vector<8x32xf32>, vector<32x32xf32>, vector<8x32xf32> -> vector<8x32xf32>
    %c3_40 = arith.constant 3 : index
    %c0_41 = arith.constant 0 : index
    %c0_42 = arith.constant 0 : index
    %43 = vector.load %arg6[%c3_40, %c0_41, %c0_42] : memref<4x32x32xf32, #tpu.memory_space<vmem>>, vector<1x32x32xf32>
    %44 = vector.shape_cast %43 : vector<1x32x32xf32> to vector<32x32xf32>
    %cst_43 = arith.constant dense<0.000000e+00> : vector<8x32xf32>
    %45 = tpu.matmul %5, %44, %cst_43 {dimension_numbers = #tpu.dot_dimension_numbers<[1], [0], [0], [1], [0, 0, 1, 1], [], []>} : vector<8x32xf32>, vector<32x32xf32>, vector<8x32xf32> -> vector<8x32xf32>
    %46 = arith.addf %42, %45 : vector<8x32xf32>
    %c3_44 = arith.constant 3 : index
    %c0_45 = arith.constant 0 : index
    %c0_46 = arith.constant 0 : index
    %47 = vector.load %arg7[%c3_44, %c0_45, %c0_46] : memref<4x1x32xf32, #tpu.memory_space<vmem>>, vector<1x1x32xf32>
    %48 = vector.shape_cast %47 : vector<1x1x32xf32> to vector<1x32xf32>
    %49 = vector.broadcast %48 : vector<1x32xf32> to vector<8x32xf32>
    %50 = arith.addf %46, %49 : vector<8x32xf32>
    %cst_47 = arith.constant 1.000000e+00 : f32
    %51 = vector.broadcast %cst_47 : f32 to vector<8x32xf32>
    %52 = arith.addf %39, %51 : vector<8x32xf32>
    %53 = arith.negf %52 : vector<8x32xf32>
    %54 = math.exp %53 : vector<8x32xf32>
    %cst_48 = arith.constant 1.000000e+00 : f32
    %55 = vector.broadcast %cst_48 : f32 to vector<8x32xf32>
    %56 = arith.addf %55, %54 : vector<8x32xf32>
    %57 = arith.divf %55, %56 : vector<8x32xf32>
    %58 = arith.mulf %6, %57 : vector<8x32xf32>
    %59 = arith.negf %17 : vector<8x32xf32>
    %60 = math.exp %59 : vector<8x32xf32>
    %cst_49 = arith.constant 1.000000e+00 : f32
    %61 = vector.broadcast %cst_49 : f32 to vector<8x32xf32>
    %62 = arith.addf %61, %60 : vector<8x32xf32>
    %63 = arith.divf %61, %62 : vector<8x32xf32>
    %64 = math.tanh %28 : vector<8x32xf32>
    %65 = arith.mulf %63, %64 : vector<8x32xf32>
    %66 = arith.addf %58, %65 : vector<8x32xf32>
    %67 = math.tanh %66 : vector<8x32xf32>
    %68 = arith.negf %50 : vector<8x32xf32>
    %69 = math.exp %68 : vector<8x32xf32>
    %cst_50 = arith.constant 1.000000e+00 : f32
    %70 = vector.broadcast %cst_50 : f32 to vector<8x32xf32>
    %71 = arith.addf %70, %69 : vector<8x32xf32>
    %72 = arith.divf %70, %71 : vector<8x32xf32>
    %73 = arith.mulf %67, %72 : vector<8x32xf32>
    %c0_51 = arith.constant 0 : index
    %c0_52 = arith.constant 0 : index
    %c0_53 = arith.constant 0 : index
    %74 = vector.load %arg2[%c0_51, %c0_52, %c0_53] : memref<1x8x1xf32, #tpu.memory_space<vmem>>, vector<1x8x1xf32>
    %75 = vector.shape_cast %74 : vector<1x8x1xf32> to vector<8x1xf32>
    %76 = arith.subf %66, %6 : vector<8x32xf32>
    %77 = vector.broadcast %75 : vector<8x1xf32> to vector<8x32xf32>
    %78 = arith.mulf %77, %76 : vector<8x32xf32>
    %79 = arith.addf %6, %78 : vector<8x32xf32>
    %80 = arith.subf %73, %5 : vector<8x32xf32>
    %81 = vector.broadcast %75 : vector<8x1xf32> to vector<8x32xf32>
    %82 = arith.mulf %81, %80 : vector<8x32xf32>
    %83 = arith.addf %5, %82 : vector<8x32xf32>
    %c0_54 = arith.constant 0 : index
    %c0_55 = arith.constant 0 : index
    %84 = vector.load %arg11[%c0_54, %c0_55] : memref<8x32xf32, #tpu.memory_space<vmem>>, vector<8x32xf32>
    tpu.vector_store %arg11[%c0_54, %c0_55], %79 {strides = array<i32>} : memref<8x32xf32, #tpu.memory_space<vmem>>, vector<8x32xf32>,
    %c0_56 = arith.constant 0 : index
    %c0_57 = arith.constant 0 : index
    %85 = vector.load %arg10[%c0_56, %c0_57] : memref<8x32xf32, #tpu.memory_space<vmem>>, vector<8x32xf32>
    tpu.vector_store %arg10[%c0_56, %c0_57], %83 {strides = array<i32>} : memref<8x32xf32, #tpu.memory_space<vmem>>, vector<8x32xf32>,
    %c0_58 = arith.constant 0 : index
    %c0_59 = arith.constant 0 : index
    %c0_60 = arith.constant 0 : index
    %86 = vector.load %arg9[%c0_58, %c0_59, %c0_60] : memref<1x8x32xf32, #tpu.memory_space<vmem>>, vector<1x8x32xf32>
    %87 = vector.shape_cast %86 : vector<1x8x32xf32> to vector<8x32xf32>
    %88 = vector.shape_cast %79 : vector<8x32xf32> to vector<1x8x32xf32>
    tpu.vector_store %arg9[%c0_58, %c0_59, %c0_60], %88 {strides = array<i32>} : memref<1x8x32xf32, #tpu.memory_space<vmem>>, vector<1x8x32xf32>,
    %c0_61 = arith.constant 0 : index
    %c0_62 = arith.constant 0 : index
    %c0_63 = arith.constant 0 : index
    %89 = vector.load %arg8[%c0_61, %c0_62, %c0_63] : memref<1x8x32xf32, #tpu.memory_space<vmem>>, vector<1x8x32xf32>
    %90 = vector.shape_cast %89 : vector<1x8x32xf32> to vector<8x32xf32>
    %91 = vector.shape_cast %83 : vector<8x32xf32> to vector<1x8x32xf32>
    tpu.vector_store %arg8[%c0_61, %c0_62, %c0_63], %91 {strides = array<i32>} : memref<1x8x32xf32, #tpu.memory_space<vmem>>, vector<1x8x32xf32>,
    return
  }
  func.func @transform_0(%arg0: i32) -> (i32, i32, i32) {
    %c0_i32 = arith.constant 0 : i32
    %c0_i32_0 = arith.constant 0 : i32
    %c0_i32_1 = arith.constant 0 : i32
    return %arg0, %c0_i32, %c0_i32_0 : i32, i32, i32
  }
  func.func @transform_1(%arg0: i32) -> (i32, i32, i32) {
    %c0_i32 = arith.constant 0 : i32
    %c0_i32_0 = arith.constant 0 : i32
    %c0_i32_1 = arith.constant 0 : i32
    return %arg0, %c0_i32, %c0_i32_0 : i32, i32, i32
  }
  func.func @transform_2(%arg0: i32) -> (i32, i32) {
    %c0_i32 = arith.constant 0 : i32
    %c0_i32_0 = arith.constant 0 : i32
    %c0_i32_1 = arith.constant 0 : i32
    return %c0_i32, %c0_i32_0 : i32, i32
  }
  func.func @transform_3(%arg0: i32) -> (i32, i32) {
    %c0_i32 = arith.constant 0 : i32
    %c0_i32_0 = arith.constant 0 : i32
    %c0_i32_1 = arith.constant 0 : i32
    return %c0_i32, %c0_i32_0 : i32, i32
  }
  func.func @transform_4(%arg0: i32) -> (i32, i32, i32) {
    %c0_i32 = arith.constant 0 : i32
    %c0_i32_0 = arith.constant 0 : i32
    %c0_i32_1 = arith.constant 0 : i32
    %c0_i32_2 = arith.constant 0 : i32
    return %c0_i32, %c0_i32_0, %c0_i32_1 : i32, i32, i32
  }
  func.func @transform_5(%arg0: i32) -> (i32, i32, i32) {
    %c0_i32 = arith.constant 0 : i32
    %c0_i32_0 = arith.constant 0 : i32
    %c0_i32_1 = arith.constant 0 : i32
    %c0_i32_2 = arith.constant 0 : i32
    return %c0_i32, %c0_i32_0, %c0_i32_1 : i32, i32, i32
  }
  func.func @transform_6(%arg0: i32) -> (i32, i32, i32) {
    %c0_i32 = arith.constant 0 : i32
    %c0_i32_0 = arith.constant 0 : i32
    %c0_i32_1 = arith.constant 0 : i32
    %c0_i32_2 = arith.constant 0 : i32
    return %c0_i32, %c0_i32_0, %c0_i32_1 : i32, i32, i32
  }
  func.func @transform_7(%arg0: i32) -> (i32, i32, i32) {
    %c0_i32 = arith.constant 0 : i32
    %c0_i32_0 = arith.constant 0 : i32
    %c0_i32_1 = arith.constant 0 : i32
    return %arg0, %c0_i32, %c0_i32_0 : i32, i32, i32
  }
  func.func @transform_8(%arg0: i32) -> (i32, i32, i32) {
    %c0_i32 = arith.constant 0 : i32
    %c0_i32_0 = arith.constant 0 : i32
    %c0_i32_1 = arith.constant 0 : i32
    return %arg0, %c0_i32, %c0_i32_0 : i32, i32, i32
  }
}

</mosaic_0001>

<bundles_post_ra>
// kernel: tpu_custom_call.1
= control target key start
LH: loop header
LB: loop body
LE: loop exit
PB: predicated region body
PF: predicated region fallthrough
CT: control target
= control target key end

     0   :  { %14 = vsyncpa [#allocation5], 0  ;;  %s1335_s0 = inlined_call_operand.vmem [shape: f32[1,8,32], index: 0, kind: input, shape index: {}]   ;;  %s1336_s1 = inlined_call_operand.vmem [shape: f32[1,8,1], index: 1, kind: input, shape index: {}]   ;;  %s1337_s2 = inlined_call_operand.vmem [shape: f32[8,32], index: 2, kind: input, shape index: {}]   ;;  %s1338_s3 = inlined_call_operand.hbm [shape: f32[8,32], index: 3, kind: input, shape index: {}]   ;;  %s1339_s4 = inlined_call_operand.hbm [shape: f32[4,32,32], index: 4, kind: input, shape index: {}]   ;;  %s1340_s5 = inlined_call_operand.hbm [shape: f32[4,32,32], index: 5, kind: input, shape index: {}]   ;;  %s1341_s6 = inlined_call_operand.vmem [shape: f32[4,1,32], index: 6, kind: input, shape index: {}]   ;;  %s1342_s7 = inlined_call_operand.hbm [shape: f32[1,8,32], index: 7, kind: output, shape index: {0}]   ;;  %s1343_s8 = inlined_call_operand.hbm [shape: f32[1,8,32], index: 8, kind: output, shape index: {1}]  }
   0x1   :  { %15 = vsyncpa [#allocation8], 0 }
   0x2   :  { %16 = vsyncpa [#allocation6], 0 }
   0x3   :  { %17 = vsyncpa [#allocation12], 0  ;;  %s1132_s27 = smov [#allocation7]   ;;  %s1014_s9 = scalar_lea.hbm %s1339_s4, 2048 }
   0x4   :  { %s39_s28 = sshll.u32 %s1132_s27, 4  ;;  %p1015_p0 = scmp.ne.s32.totalorder %s1339_s4, %s1014_s9  ;;  %s40_s28 = int_to_ptr.vmem [resolvable:$true] %s39_s28 }
   0x5   :  { %p1018_p1 = scmp.lt.u32.totalorder %s1014_s9, %s1339_s4 }
   0x7   :  { %p1020_p2 = pnand %p1018_p1, %p1015_p0 }
   0x9   :  { %1023 = shalt.err (!%p1020_p2)
}
   0xa   :  { %s1024_s14 = scalar_lea.vmem %s40_s28, 2048  ;;  %p1029_p4 = scmp.lt.s32.totalorder %s40_s28, %s40_s28 }
   0xb   :  { %p1025_p3 = scmp.ne.s32.totalorder %s40_s28, %s1024_s14  ;;  %p1030_p5 = scmp.lt.s32.totalorder %s1024_s14, %s1024_s14 }
   0xd   :  { %p1031_p6 = por %p1030_p5, %p1029_p4 }
   0xf   :  { %p1032_p7 = pnand %p1031_p6, %p1025_p3 }
  0x11   :  { %1035 = shalt.err (!%p1032_p7)
}
  0x12   :  { %s1133_s15 = smov 128   ;;  %s1134_s16 = smov 8  }
  0x13   :  { %45 = dma.hbm_to_vmem [thread:$0]  %s1339_s4, 2048, %s40_s28, [#allocation8], %s1133_s15, %s1133_s15, %s1134_s16  }
  0x14   :  { %s1135_s19 = smov [#allocation4]   ;;  %s1136_s21 = smov [#allocation9]  }
  0x15   :  { %s30_s20 = sshll.u32 %s1135_s19, 4  ;;  %s51_s22 = sshll.u32 %s1136_s21, 4  ;;  %s31_s20 = int_to_ptr.vmem [resolvable:$true] %s30_s20  ;;  %s52_s22 = int_to_ptr.vmem [resolvable:$true] %s51_s22 }
  0x16   :  { %s1036_s25 = scalar_lea.hbm %s1338_s3, 128 }
  0x17   :  { %p1037_p8 = scmp.ne.s32.totalorder %s1338_s3, %s1036_s25  ;;  %p1040_p9 = scmp.lt.u32.totalorder %s1036_s25, %s1338_s3 }
  0x19   :  { %p1042_p10 = pnand %p1040_p9, %p1037_p8 }
  0x1b   :  { %1045 = shalt.err (!%p1042_p10)
}
  0x1c   :  { %s1046_s4 = scalar_lea.vmem %s31_s20, 128  ;;  %p1051_p12 = scmp.lt.s32.totalorder %s31_s20, %s31_s20 }
  0x1d   :  { %p1047_p11 = scmp.ne.s32.totalorder %s31_s20, %s1046_s4  ;;  %p1052_p13 = scmp.lt.s32.totalorder %s1046_s4, %s1046_s4 }
  0x1f   :  { %p1053_p0 = por %p1052_p13, %p1051_p12 }
  0x21   :  { %p1054_p1 = pnand %p1053_p0, %p1047_p11 }
  0x23   :  { %1057 = shalt.err (!%p1054_p1)
}
  0x24   :  { %33 = dma.hbm_to_vmem [thread:$0]  %s1338_s3, 128, %s31_s20, [#allocation5]  }
  0x25   :  { %s1058_s12 = scalar_lea.hbm %s1340_s5, 2048 }
  0x26   :  { %p1059_p2 = scmp.ne.s32.totalorder %s1340_s5, %s1058_s12  ;;  %p1062_p3 = scmp.lt.u32.totalorder %s1058_s12, %s1340_s5 }
  0x28   :  { %p1064_p4 = pnand %p1062_p3, %p1059_p2 }
  0x2a   :  { %1067 = shalt.err (!%p1064_p4)
}
  0x2b   :  { %s1068_s19 = scalar_lea.vmem %s52_s22, 2048  ;;  %p1073_p6 = scmp.lt.s32.totalorder %s52_s22, %s52_s22 }
  0x2c   :  { %p1069_p5 = scmp.ne.s32.totalorder %s52_s22, %s1068_s19  ;;  %p1074_p7 = scmp.lt.s32.totalorder %s1068_s19, %s1068_s19 }
  0x2e   :  { %p1075_p8 = por %p1074_p7, %p1073_p6 }
  0x30   :  { %p1076_p9 = pnand %p1075_p8, %p1069_p5 }
  0x32   :  { %1079 = shalt.err (!%p1076_p9)
}
  0x33   :  { %57 = dma.hbm_to_vmem [thread:$0]  %s1340_s5, 2048, %s52_s22, [#allocation8], %s1133_s15, %s1133_s15, %s1134_s16  }
  0x34   :  { %1124 = dma.done.wait [#allocation5], 128  }
  0x35   :  { %1125 = vsyncadd [#allocation5], 4294967168 }
  0x36   :  { %1126 = dma.done.wait [#allocation8], 4096  }
  0x37   :  { %1127 = vsyncadd [#allocation8], 4294963200  ;;  %v1137_v0 = vmov 0.0|0.0   ;;  %vm1138_vm0 = vmmov 0   ;;  %v1139_v1 = vmov 0.0   ;;  %v1140_v2 = vmov 0  }
  0x38   :  { %938 = vmatprep.subr.bf16.mxu0 %v1137_v0  ;;  %944 = vmatprep.subr.bf16.mxu1 %v1137_v0  ;;  %v85_v3 = vld [vmem:[#allocation9] sm:$0xff]  ;;  %v86_v4 = vld [vmem:[#allocation9 + $0x8] sm:$0xff]  ;;  %vm74_vm1 = vcmask 261120   ;;  %v87_v8 = vld [vmem:[#allocation9 + $0x10] sm:$0xff] }
  0x39   :  { %858 = vmatprep.mubr.msk.f32.mxu0 %vm1138_vm0, %v1139_v1  ;;  %869 = vmatprep.mubr.msk.f32.mxu1 %vm1138_vm0, %v1139_v1  ;;  %v81_v5 = vld [vmem:[#allocation7] sm:$0xff]  ;;  %v939_v6 = vpack.c.bf16 %v86_v4, %v85_v3  ;;  %v82_v7 = vld [vmem:[#allocation7 + $0x8] sm:$0xff]  ;;  %v88_v9 = vld [vmem:[#allocation9 + $0x18] sm:$0xff] }
  0x3a   :  { %997 = vset.pattern.permute.xlu0 %v1140_v2  ;;  %v945_v10 = vpack.c.bf16 %v82_v7, %v81_v5  ;;  %v83_v11 = vld [vmem:[#allocation7 + $0x10] sm:$0xff]  ;;  %v84_v12 = vld [vmem:[#allocation7 + $0x18] sm:$0xff]  ;;  %v73_v13 = vld [vmem:[%s1337_s2] sm:$0xff]  ;;  %v942_v14 = vpack.c.bf16 %v88_v9, %v87_v8 }
  0x3b   :  { %940 = vmatpush3.bf16.msra.mxu0 %v939_v6  ;;  %75 = vst.msk [vmem:[#allocation2] sm:$0xff] %vm74_vm1, %v73_v13  ;;  %v948_v15 = vpack.c.bf16 %v84_v12, %v83_v11  ;;  %v250_v16 = vld [vmem:[#allocation9 + $0x20] sm:$0xff]  ;;  %v251_v17 = vld [vmem:[#allocation9 + $0x28] sm:$0xff]  ;;  %v252_v23 = vld [vmem:[#allocation9 + $0x30] sm:$0xff] }
  0x3c   :  { %946 = vmatpush3.bf16.msra.mxu1 %v945_v10  ;;  %941 = vmatprep.subr.bf16.mxu0 %v1137_v0  ;;  %v245_v18 = vld [vmem:[#allocation7 + $0x20] sm:$0xff]  ;;  %v246_v19 = vld [vmem:[#allocation7 + $0x28] sm:$0xff]  ;;  %v951_v21 = vpack.c.bf16 %v251_v17, %v250_v16  ;;  %v253_v24 = vld [vmem:[#allocation9 + $0x38] sm:$0xff] }
  0x3d   :  { %947 = vmatprep.subr.bf16.mxu1 %v1137_v0  ;;  %v1245_v20 = vld [vmem:[%s1335_s0] sm:$0xff]  ;;  %v957_v22 = vpack.c.bf16 %v246_v19, %v245_v18  ;;  %v247_v25 = vld [vmem:[#allocation7 + $0x30] sm:$0xff]  ;;  %v248_v26 = vld [vmem:[#allocation7 + $0x38] sm:$0xff]  ;;  %v954_v28 = vpack.c.bf16 %v253_v24, %v252_v23 }
  0x3e   :  { %v960_v29 = vpack.c.bf16 %v248_v26, %v247_v25  ;;  %v409_v30 = vld [vmem:[#allocation9 + $0x40] sm:$0xff]  ;;  %v746_v31 = vld [vmem:[%s1336_s1] sm:$0xff]  ;;  %v411_v37 = vld [vmem:[#allocation9 + $0x50] sm:$0xff] }
  0x3f   :  { %943 = vmatpush3.bf16.msra.mxu0 %v942_v14  ;;  %v410_v32 = vld [vmem:[#allocation9 + $0x48] sm:$0xff]  ;;  %v404_v33 = vld [vmem:[#allocation7 + $0x40] sm:$0xff]  ;;  %750 = vperm.xlu0 %997, %v746_v31   ;;  %v412_v38 = vld [vmem:[#allocation9 + $0x58] sm:$0xff] }
  0x40   :  { %949 = vmatpush3.bf16.msra.mxu1 %v948_v15  ;;  %950 = vmatprep.subr.bf16.mxu0 %v1137_v0  ;;  %v405_v34 = vld [vmem:[#allocation7 + $0x48] sm:$0xff]  ;;  %v963_v35 = vpack.c.bf16 %v410_v32, %v409_v30  ;;  %v406_v39 = vld [vmem:[#allocation7 + $0x50] sm:$0xff]  ;;  %v407_v40 = vld [vmem:[#allocation7 + $0x58] sm:$0xff]  ;;  %v966_v41 = vpack.c.bf16 %v412_v38, %v411_v37 }
  0x41   :  { %956 = vmatprep.subr.bf16.mxu1 %v1137_v0  ;;  %v969_v36 = vpack.c.bf16 %v405_v34, %v404_v33  ;;  %v972_v42 = vpack.c.bf16 %v407_v40, %v406_v39  ;;  %v568_v43 = vld [vmem:[#allocation9 + $0x60] sm:$0xff]  ;;  %v569_v44 = vld [vmem:[#allocation9 + $0x68] sm:$0xff]  ;;  %v570_v49 = vld [vmem:[#allocation9 + $0x70] sm:$0xff] }
  0x42   :  { %v1249_v27 = vld [vmem:[#allocation2] sm:$0xff]  ;;  %v563_v45 = vld [vmem:[#allocation7 + $0x60] sm:$0xff]  ;;  %v975_v47 = vpack.c.bf16 %v569_v44, %v568_v43  ;;  %v571_v50 = vld [vmem:[#allocation9 + $0x78] sm:$0xff] }
  0x43   :  { %859 = vmatmul.mubr.msk.f32.vlgmr.msra.gmra.mrb[0].mxu0 %vm74_vm1, %v1249_v27  ;;  %870 = vmatmul.mubr.msk.f32.vlgmr.msra.gmra.mrb[0].mxu1 %vm74_vm1, %v1245_v20  ;;  %v564_v46 = vld [vmem:[#allocation7 + $0x68] sm:$0xff]  ;;  %v565_v51 = vld [vmem:[#allocation7 + $0x70] sm:$0xff]  ;;  %v566_v52 = vld [vmem:[#allocation7 + $0x78] sm:$0xff]  ;;  %v978_v53 = vpack.c.bf16 %v571_v50, %v570_v49 }
  0x44   :  { %952 = vmatpush3.bf16.msra.mxu0 %v951_v21  ;;  %958 = vmatpush3.bf16.msra.mxu1 %v957_v22  ;;  %v981_v48 = vpack.c.bf16 %v564_v46, %v563_v45  ;;  %v984_v54 = vpack.c.bf16 %v566_v52, %v565_v51  ;;  %v76_v55 = vld [vmem:[#allocation4] sm:$0xff]  ;;  %v794_v58 = vld [vmem:[%s1341_s6] ss:$0 sm:$0xff]  ;;  %v798_v5 = vld [vmem:[%s1341_s6 + $0x1] ss:$0 sm:$0xff] }
  0x45   :  { %953 = vmatprep.subr.bf16.mxu0 %v1137_v0  ;;  %959 = vmatprep.subr.bf16.mxu1 %v1137_v0  ;;  %77 = vst.msk [vmem:[#allocation3] sm:$0xff] %vm74_vm1, %v76_v55  ;;  %v802_v9 = vld [vmem:[%s1341_s6 + $0x2] ss:$0 sm:$0xff] }
  0x46   :  { %880 = vmatprep.mubr.msk.f32.mxu0 %vm1138_vm0, %v1139_v1  ;;  %891 = vmatprep.mubr.msk.f32.mxu1 %vm1138_vm0, %v1139_v1 }
  0x48   :  { %955 = vmatpush3.bf16.msra.mxu0 %v954_v28  ;;  %961 = vmatpush3.bf16.msra.mxu1 %v960_v29 }
  0x49   :  { %962 = vmatprep.subr.bf16.mxu0 %v1137_v0  ;;  %968 = vmatprep.subr.bf16.mxu1 %v1137_v0 }
  0x4b   :  { %881 = vmatmul.mubr.msk.f32.vlgmr.msra.gmra.mrb[2].mxu0 %vm74_vm1, %v1249_v27  ;;  %892 = vmatmul.mubr.msk.f32.vlgmr.msra.gmra.mrb[2].mxu1 %vm74_vm1, %v1245_v20 }
  0x4c   :  { %964 = vmatpush3.bf16.msra.mxu0 %v963_v35  ;;  %970 = vmatpush3.bf16.msra.mxu1 %v969_v36  ;;  %v80_v33 = vld [vmem:[#allocation3] sm:$0xff] }
  0x4d   :  { %965 = vmatprep.subr.bf16.mxu0 %v1137_v0  ;;  %971 = vmatprep.subr.bf16.mxu1 %v1137_v0 }
  0x4e   :  { %902 = vmatprep.mubr.msk.f32.mxu0 %vm1138_vm0, %v1139_v1  ;;  %913 = vmatprep.mubr.msk.f32.mxu1 %vm1138_vm0, %v1139_v1 }
  0x50   :  { %967 = vmatpush3.bf16.msra.mxu0 %v966_v41  ;;  %973 = vmatpush3.bf16.msra.mxu1 %v972_v42 }
  0x51   :  { %974 = vmatprep.subr.bf16.mxu0 %v1137_v0  ;;  %980 = vmatprep.subr.bf16.mxu1 %v1137_v0 }
  0x53   :  { %903 = vmatmul.mubr.msk.f32.vlgmr.msra.gmra.mrb[4].mxu0 %vm74_vm1, %v1249_v27  ;;  %914 = vmatmul.mubr.msk.f32.vlgmr.msra.gmra.mrb[4].mxu1 %vm74_vm1, %v1245_v20 }
  0x54   :  { %976 = vmatpush3.bf16.msra.mxu0 %v975_v47  ;;  %982 = vmatpush3.bf16.msra.mxu1 %v981_v48 }
  0x55   :  { %977 = vmatprep.subr.bf16.mxu0 %v1137_v0  ;;  %983 = vmatprep.subr.bf16.mxu1 %v1137_v0 }
  0x56   :  { %924 = vmatprep.mubr.msk.f32.mxu0 %vm1138_vm0, %v1139_v1  ;;  %935 = vmatprep.mubr.msk.f32.mxu1 %vm1138_vm0, %v1139_v1 }
  0x58   :  { %979 = vmatpush3.bf16.msra.mxu0 %v978_v53  ;;  %985 = vmatpush3.bf16.msra.mxu1 %v984_v54 }
  0x5b   :  { %925 = vmatmul.mubr.msk.f32.vlgmr.msra.gmra.mrb[6].mxu0 %vm74_vm1, %v1249_v27  ;;  %936 = vmatmul.mubr.msk.f32.vlgmr.msra.gmra.mrb[6].mxu1 %vm74_vm1, %v1245_v20  ;;  %v806_v20 = vld [vmem:[%s1341_s6 + $0x3] ss:$0 sm:$0xff]  ;;  %s1141_s6 = smov [#allocation11]  }
  0x5c   :  { %s778_s30 = sshll.u32 %s1141_s6, 4  ;;  %s779_s30 = int_to_ptr.vmem [resolvable:$true] %s778_s30 }
  0x5d   :  { %s1080_s4 = scalar_lea.vmem %s779_s30, 128  ;;  %p1085_p11 = scmp.lt.s32.totalorder %s779_s30, %s779_s30 }
  0x5e   :  { %p1081_p10 = scmp.ne.s32.totalorder %s779_s30, %s1080_s4  ;;  %p1086_p12 = scmp.lt.s32.totalorder %s1080_s4, %s1080_s4 }
  0x60   :  { %p1087_p13 = por %p1086_p12, %p1085_p11 }
  0x62   :  { %p1088_p0 = pnand %p1087_p13, %p1081_p10 }
  0xbe   :  { %v751_v38 = vpop.permute.xlu0 %750 }
 0x116   :  { %v159_v56 = vpop.f32.mrb[0].mxu0  ;;  %v232_v57 = vpop.f32.mrb[0].mxu1 }
 0x117   :  { %v233_v59 = vadd.f32 %v232_v57, %v159_v56  ;;  %v860_v60 = vpop.f32.mrb[1].mxu0  ;;  %v871_v61 = vpop.f32.mrb[1].mxu1 }
 0x119   :  { %v243_v62 = vadd.f32 %v794_v58, %v233_v59 }
 0x11b   :  { %v808_v63 = vmul.f32 -1.442695, %v243_v62 }
 0x11d   :  { %998 = vpow2.f32 %v808_v63 }
 0x11e   :  { %v320_v0 = vpop.f32.mrb[2].mxu0  ;;  %v390_v1 = vpop.f32.mrb[2].mxu1 }
 0x11f   :  { %v391_v2 = vadd.f32 %v390_v1, %v320_v0  ;;  %v882_v3 = vpop.f32.mrb[3].mxu0  ;;  %v893_v4 = vpop.f32.mrb[3].mxu1 }
 0x121   :  { %v402_v6 = vadd.f32 %v798_v5, %v391_v2 }
 0x123   :  { %1000 = vtanh.f32 %v402_v6 }
 0x126   :  { %v479_v7 = vpop.f32.mrb[4].mxu0  ;;  %v549_v8 = vpop.f32.mrb[4].mxu1 }
 0x127   :  { %v999_v10 = vpop.eup %998  ;;  %v550_v11 = vadd.f32 %v549_v8, %v479_v7  ;;  %v904_v12 = vpop.f32.mrb[5].mxu0 }
 0x128   :  { %v915_v13 = vpop.f32.mrb[5].mxu1  ;;  %v732_v14 = vadd.f32 1.0, %v999_v10 }
 0x129   :  { %v561_v15 = vadd.f32 %v802_v9, %v550_v11 }
 0x12a   :  { %1002 = vrcp.f32 %v732_v14 }
 0x12b   :  { %v721_v16 = vadd.f32 1.0, %v561_v15 }
 0x12d   :  { %v807_v17 = vmul.f32 -1.442695, %v721_v16  ;;  %v1001_v25 = vpop.eup %1000 }
 0x12e   :  { %v638_v18 = vpop.f32.mrb[6].mxu0  ;;  %v708_v19 = vpop.f32.mrb[6].mxu1 }
 0x12f   :  { %1004 = vpow2.f32 %v807_v17  ;;  %v709_v21 = vadd.f32 %v708_v19, %v638_v18  ;;  %v926_v22 = vpop.f32.mrb[7].mxu0  ;;  %v937_v23 = vpop.f32.mrb[7].mxu1 }
 0x131   :  { %v720_v24 = vadd.f32 %v806_v20, %v709_v21 }
 0x133   :  { %v809_v28 = vmul.f32 -1.442695, %v720_v24 }
 0x134   :  { %v1003_v26 = vpop.eup %1002 }
 0x135   :  { %v736_v29 = vmul.f32 %v1003_v26, %v1001_v25  ;;  %1006 = vpow2.f32 %v809_v28 }
 0x139   :  { %v1005_v30 = vpop.eup %1004 }
 0x13a   :  { %v725_v31 = vadd.f32 1.0, %v1005_v30 }
 0x13c   :  { %1008 = vrcp.f32 %v725_v31 }
 0x13f   :  { %v1007_v32 = vpop.eup %1006 }
 0x140   :  { %v742_v34 = vadd.f32 1.0, %v1007_v32 }
 0x142   :  { %1010 = vrcp.f32 %v742_v34 }
 0x146   :  { %v1009_v35 = vpop.eup %1008 }
 0x147   :  { %v728_v36 = vmul.f32 %v1009_v35, %v80_v33 }
 0x149   :  { %v737_v37 = vadd.f32 %v736_v29, %v728_v36 }
 0x14b   :  { %1012 = vtanh.f32 %v737_v37  ;;  %v747_v39 = vsub.f32 %v737_v37, %v80_v33 }
 0x14d   :  { %v753_v40 = vmul.f32 %v751_v38, %v747_v39 }
 0x14f   :  { %v754_v41 = vadd.f32 %v753_v40, %v80_v33 }
 0x151   :  { %758 = vst.msk [vmem:[#allocation3] sm:$0xff] %vm74_vm1, %v754_v41  ;;  %760 = vst.msk [vmem:[#allocation11] sm:$0xff] %vm74_vm1, %v754_v41 }
 0x152   :  { %1091 = shalt.err (!%p1088_p0)
}
 0x153   :  { %s1092_s10 = scalar_lea.hbm %s1343_s8, 128 }
 0x154   :  { %p1093_p1 = scmp.ne.s32.totalorder %s1343_s8, %s1092_s10  ;;  %p1096_p2 = scmp.lt.u32.totalorder %s1092_s10, %s1343_s8 }
 0x156   :  { %p1098_p3 = pnand %p1096_p2, %p1093_p1 }
 0x158   :  { %1101 = shalt.err (!%p1098_p3)
}
 0x159   :  { %781 = dma.vmem_to_hbm [thread:$0]  %s779_s30, 128, %s1343_s8, [#allocation12]   ;;  %v1011_v42 = vpop.eup %1010 }
 0x15a   :  { %v1013_v43 = vpop.eup %1012  ;;  %s1142_s19 = smov [#allocation10]  }
 0x15b   :  { %v745_v44 = vmul.f32 %v1013_v43, %v1011_v42  ;;  %s768_s3 = sshll.u32 %s1142_s19, 4  ;;  %s769_s3 = int_to_ptr.vmem [resolvable:$true] %s768_s3 }
 0x15c   :  { %s1102_s20 = scalar_lea.vmem %s769_s3, 128  ;;  %p1107_p5 = scmp.lt.s32.totalorder %s769_s3, %s769_s3 }
 0x15d   :  { %v755_v45 = vsub.f32 %v745_v44, %v1249_v27  ;;  %p1103_p4 = scmp.ne.s32.totalorder %s769_s3, %s1102_s20  ;;  %p1108_p6 = scmp.lt.s32.totalorder %s1102_s20, %s1102_s20 }
 0x15f   :  { %v756_v46 = vmul.f32 %v755_v45, %v751_v38  ;;  %p1109_p7 = por %p1108_p6, %p1107_p5 }
 0x161   :  { %v757_v47 = vadd.f32 %v756_v46, %v1249_v27  ;;  %p1110_p8 = pnand %p1109_p7, %p1103_p4 }
 0x163   :  { %759 = vst.msk [vmem:[#allocation2] sm:$0xff] %vm74_vm1, %v757_v47  ;;  %761 = vst.msk [vmem:[#allocation10] sm:$0xff] %vm74_vm1, %v757_v47 }
 0x164   :  { %1113 = shalt.err (!%p1110_p8)
}
 0x165   :  { %s1114_s15 = scalar_lea.hbm %s1342_s7, 128 }
 0x166   :  { %p1115_p9 = scmp.ne.s32.totalorder %s1342_s7, %s1114_s15  ;;  %p1118_p10 = scmp.lt.u32.totalorder %s1114_s15, %s1342_s7 }
 0x168   :  { %p1120_p11 = pnand %p1118_p10, %p1115_p9 }
 0x16a   :  { %1123 = shalt.err (!%p1120_p11)
}
 0x16b   :  { %771 = dma.vmem_to_hbm [thread:$0]  %s769_s3, 128, %s1342_s7, [#allocation6]  }
 0x16c   :  { %1128 = dma.done.wait [#allocation6], 128  }
 0x16d   :  { %1129 = vsyncadd [#allocation6], 4294967168 }
 0x16e   :  { %1130 = dma.done.wait [#allocation12], 128  }
 0x16f   :  { %1131 = vsyncadd [#allocation12], 4294967168 }
 0x170   :  { %788 = vsyncpa [#allocation5], 1 }
 0x171   :  { %789 = vsyncpa [#allocation8], 1 }
 0x172   :  { %790 = vsyncpa [#allocation6], 1 }
 0x173   :  { %791 = vsyncpa [#allocation12], 1 }

</bundles_post_ra>
